<compile_context>
chip_gen: v5e
topology: v5e:2x2
jax: 0.10.0
libtpu: 0.0.40
codegen_flags: <defaults>
</compile_context>

<pallas_src>
import jax
import jax.numpy as jnp
import numpy as np
from jax.experimental import pallas as pl
from jax.experimental.pallas import tpu as pltpu


def _toeplitz_weight(w, win, wout, pad):
    """Expand conv weights (3,3,Cin,Cout) into per-kh dense matrices.

    Result[kh] maps a flattened image row (win*Cin lanes, layout (w, c)) to a
    flattened output row (wout*Cout lanes, layout (w, c)), folding the stride-2
    W-direction taps (with `pad` zero padding) into one dense matmul.
    """
    kh, kw, cin, cout = w.shape
    sel = np.zeros((kw, win, wout), np.float32)
    for k in range(kw):
        for wo in range(wout):
            wi = 2 * wo + k - pad
            if 0 <= wi < win:
                sel[k, wi, wo] = 1.0
    t = jnp.einsum("kiv,hkco->hicvo", jnp.asarray(sel), w)   # (kh, win, cin, wout, cout)
    return t.reshape(kh, win * cin, wout * cout)


def _encoder_kernel(xr_ref, w1_ref, b1_ref, w2_ref, b2_ref, o_ref):
    """Fused conv1+ReLU+conv2+ReLU for one sample.

    xr_ref : (4, Lr, Wp*C)        f32   padded input rows grouped by (row mod 4)
    w1_ref : (3, Wp*C,  Wo1*hd)   bf16  Toeplitz-expanded conv1 weights (per kh tap)
    b1_ref : (1, Wo1*hd)          f32
    w2_ref : (3, Wo1*hd, Wo2*2hd) bf16  Toeplitz-expanded conv2 weights (per kh tap)
    b2_ref : (1, Wo2*2hd)         f32
    o_ref  : (Ho2, Wo2*2hd)       f32   conv2 output, row layout (h, (w, c))
    """
    f32 = jnp.float32
    mh = o_ref.shape[0]                 # rows per parity class = Ho1 // 2 = Ho2

    def mm(a_f32, w_bf16):
        return jnp.dot(a_f32.astype(jnp.bfloat16), w_bf16,
                       preferred_element_type=f32)

    # ---- conv1 (+bias+ReLU), split into even / odd output rows so conv2's stride-2
    # row taps become plain row selections.
    #   even output row m reads padded input rows 4m, 4m+1, 4m+2
    #   odd  output row m reads padded input rows 4m+2, 4m+3, 4m+4
    b1 = b1_ref[...]
    e0 = xr_ref[0, pl.ds(0, mh), :]     # rows 4m
    e1 = xr_ref[1, pl.ds(0, mh), :]     # rows 4m+1
    e2 = xr_ref[2, pl.ds(0, mh), :]     # rows 4m+2
    o1 = xr_ref[3, pl.ds(0, mh), :]     # rows 4m+3
    o2 = xr_ref[0, pl.ds(1, mh), :]     # rows 4m+4
    y1e = jnp.maximum(
        mm(e0, w1_ref[0]) + mm(e1, w1_ref[1]) + mm(e2, w1_ref[2]) + b1, 0.0)
    y1o = jnp.maximum(
        mm(e2, w1_ref[0]) + mm(o1, w1_ref[1]) + mm(o2, w1_ref[2]) + b1, 0.0)

    # ---- conv2 (+bias+ReLU): tap kh=1 -> even y1 rows, kh=2 -> odd y1 rows,
    # kh=0 -> previous odd row (zero for the first output row = top padding).
    t1 = mm(y1e, w2_ref[1])
    t2 = mm(y1o, w2_ref[2])
    t0 = mm(y1o, w2_ref[0])
    r = jax.lax.broadcasted_iota(jnp.int32, (mh, mh), 0)
    c = jax.lax.broadcasted_iota(jnp.int32, (mh, mh), 1)
    shift_down = (r == c + 1).astype(f32)            # (S @ t0)[r] = t0[r-1], row 0 -> 0
    t0s = jnp.dot(shift_down, t0, preferred_element_type=f32)
    o_ref[...] = jnp.maximum(t0s + t1 + t2 + b2_ref[...], 0.0).astype(o_ref.dtype)


def _encoder_pallas_call(xr, w1t, b1t, w2t, b2t, ho2, out_cols):
    n, n_par, lr, wc = xr.shape
    return pl.pallas_call(
        _encoder_kernel,
        out_shape=jax.ShapeDtypeStruct((n, ho2, out_cols), jnp.float32),
        grid=(n,),
        in_specs=[
            pl.BlockSpec((None, n_par, lr, wc), lambda b: (b, 0, 0, 0)),
            pl.BlockSpec(w1t.shape, lambda b: (0, 0, 0)),   # VMEM-resident weights
            pl.BlockSpec(b1t.shape, lambda b: (0, 0)),
            pl.BlockSpec(w2t.shape, lambda b: (0, 0, 0)),
            pl.BlockSpec(b2t.shape, lambda b: (0, 0)),
        ],
        out_specs=pl.BlockSpec((None, ho2, out_cols), lambda b: (b, 0, 0)),
        compiler_params=pltpu.CompilerParams(
            dimension_semantics=("parallel",)),              # 2-TC sharding on v7x
    )(xr, w1t, b1t, w2t, b2t)


class CnnEncoderPallas:
    """Pallas implementation of CnnEncoder (weights stored (kh, kw, cin, cout))."""

    def __init__(self, obs_shape, hidden_dim, key):
        H, W, C = obs_shape
        # TODO(synk): H/W not divisible by 4 would need ragged parity groups + masking;
        # not required for this demo's shapes.
        assert H % 4 == 0 and W % 4 == 0, "this Pallas encoder assumes H, W % 4 == 0"
        self.obs_shape = obs_shape
        self.hidden_dim = hidden_dim

        k1, k2, k3, k4 = jax.random.split(key, 4)
        fan1 = 3 * 3 * C
        fan2 = 3 * 3 * hidden_dim
        self.w1 = jax.random.normal(k1, (3, 3, C, hidden_dim), jnp.float32) * (2.0 / fan1) ** 0.5
        self.b1 = jax.random.normal(k2, (hidden_dim,), jnp.float32) * 0.01
        self.w2 = jax.random.normal(k3, (3, 3, hidden_dim, 2 * hidden_dim), jnp.float32) * (2.0 / fan2) ** 0.5
        self.b2 = jax.random.normal(k4, (2 * hidden_dim,), jnp.float32) * 0.01

        Wp = W + 2
        self.Ho1, self.Wo1 = H // 2, W // 2
        self.Ho2, self.Wo2 = self.Ho1 // 2, self.Wo1 // 2
        self.output_dim = 2 * hidden_dim * self.Ho2 * self.Wo2

        # Precomputed per-tap dense weights (bf16, VMEM-resident in the kernel) and
        # row-tiled biases matching the (w, c) lane layout.
        self.w1t = _toeplitz_weight(self.w1, Wp, self.Wo1, pad=0).astype(jnp.bfloat16)
        self.w2t = _toeplitz_weight(self.w2, self.Wo1, self.Wo2, pad=1).astype(jnp.bfloat16)
        self.b1t = jnp.tile(self.b1, self.Wo1).reshape(1, self.Wo1 * hidden_dim)
        self.b2t = jnp.tile(self.b2, self.Wo2).reshape(1, self.Wo2 * 2 * hidden_dim)

    def __call__(self, obs):
        # obs: (N, H, W, C) float32 — same tensor the PyTorch module receives.
        N, H, W, C = obs.shape
        hd = self.hidden_dim
        Wp = W + 2
        mh = self.Ho2                      # rows per parity class = Ho1 // 2
        lr = mh + 1

        # Pad spatially (conv padding=1) and fold (W, C) into the lane dimension.
        xp = jnp.pad(obs, ((0, 0), (1, 1), (1, 1), (0, 0))).reshape(N, H + 2, Wp * C)
        # Group padded rows by (row index mod 4): padded row 4*i + p  ->  xr[:, p, i, :]
        xp = jnp.pad(xp, ((0, 0), (0, 4 * lr - (H + 2)), (0, 0)))
        xr = xp.reshape(N, lr, 4, Wp * C).transpose(0, 2, 1, 3)

        out = _encoder_pallas_call(xr, self.w1t, self.b1t, self.w2t, self.b2t,
                                   self.Ho2, self.Wo2 * 2 * hd)

        # out is (N, Ho2, (Wo2, 2hd)) NHWC-ordered; reproduce PyTorch's NCHW flatten.
        y = out.reshape(N, self.Ho2, self.Wo2, 2 * hd).transpose(0, 3, 1, 2)
        return y.reshape(N, -1)


# ----------------------------- reference (pure JAX) -----------------------------
def _conv_ref(x, w, b):
    y = jax.lax.conv_general_dilated(
        x, w, window_strides=(2, 2), padding=((1, 1), (1, 1)),
        dimension_numbers=("NHWC", "HWIO", "NHWC"),
        precision=jax.lax.Precision.HIGHEST)
    return jnp.maximum(y + b, 0.0)


def _reference_forward(enc, obs, quantize):
    # quantize=True mirrors the kernel's bf16 rounding of activations/weights so the
    # comparison isolates kernel correctness from the deliberate bf16 MXU choice.
    cast = (lambda a: a.astype(jnp.bfloat16).astype(jnp.float32)) if quantize else (lambda a: a)
    y = _conv_ref(cast(obs), cast(enc.w1), enc.b1)
    y = _conv_ref(cast(y), cast(enc.w2), enc.b2)
    y = jnp.transpose(y, (0, 3, 1, 2))
    return y.reshape(obs.shape[0], -1)


if __name__ == "__main__":
    key = jax.random.PRNGKey(0)
    k_param, k_obs = jax.random.split(key)

    obs_shape = (16, 16, 4)   # (H, W, C)
    hidden_dim = 32
    batch = 2

    enc = CnnEncoderPallas(obs_shape, hidden_dim, k_param)
    obs = jax.random.normal(k_obs, (batch, *obs_shape), jnp.float32)

    forward = jax.jit(enc.__call__)
    out = jax.block_until_ready(forward(obs))
    assert out.shape == (batch, enc.output_dim), (out.shape, enc.output_dim)

    # Tight check vs a reference with matching bf16 rounding (kernel correctness).
    ref_q = jax.block_until_ready(_reference_forward(enc, obs, quantize=True))
    assert jnp.allclose(out, ref_q, atol=5e-3, rtol=5e-3), "mismatch vs bf16-matched reference"

    # Loose check vs the full-f32 reference (bf16 MXU quantization tolerance).
    ref_f32 = jax.block_until_ready(_reference_forward(enc, obs, quantize=False))
    assert jnp.allclose(out, ref_f32, atol=1e-1, rtol=1e-1), "mismatch vs f32 reference"

    print("KERNEL_OK")
</pallas_src>

<mosaic_0001>
module attributes {stable_mosaic.version = 11 : i64} {
  func.func @_encoder_kernel(%arg0: i32, %arg1: memref<1x4x5x72xf32, #tpu.memory_space<vmem>>, %arg2: memref<3x72x256xbf16, #tpu.memory_space<vmem>>, %arg3: memref<1x256xf32, #tpu.memory_space<vmem>>, %arg4: memref<3x256x256xbf16, #tpu.memory_space<vmem>>, %arg5: memref<1x256xf32, #tpu.memory_space<vmem>>, %arg6: memref<1x4x256xf32, #tpu.memory_space<vmem>>) attributes {dimension_semantics = [#tpu.dimension_semantics<parallel>], iteration_bounds = array<i64: 2>, scalar_prefetch = 0 : i64, scratch_operands = 0 : i64, tpu.core_type = #tpu.core_type<tc>, window_params = [{transform_indices = @transform_0, window_bounds = array<i64: 1, 4, 5, 72>}, {pipeline_mode = #tpu.pipeline_mode<synchronous>, transform_indices = @transform_1, window_bounds = array<i64: 3, 72, 256>}, {pipeline_mode = #tpu.pipeline_mode<synchronous>, transform_indices = @transform_2, window_bounds = array<i64: 1, 256>}, {pipeline_mode = #tpu.pipeline_mode<synchronous>, transform_indices = @transform_3, window_bounds = array<i64: 3, 256, 256>}, {pipeline_mode = #tpu.pipeline_mode<synchronous>, transform_indices = @transform_4, window_bounds = array<i64: 1, 256>}, {transform_indices = @transform_5, window_bounds = array<i64: 1, 4, 256>}]} {
    %c0 = arith.constant 0 : index
    %c0_0 = arith.constant 0 : index
    %0 = vector.load %arg3[%c0, %c0_0] : memref<1x256xf32, #tpu.memory_space<vmem>>, vector<1x256xf32>
    %c0_1 = arith.constant 0 : index
    %c0_2 = arith.constant 0 : index
    %c0_3 = arith.constant 0 : index
    %c0_4 = arith.constant 0 : index
    %1 = vector.load %arg1[%c0_1, %c0_2, %c0_3, %c0_4] : memref<1x4x5x72xf32, #tpu.memory_space<vmem>>, vector<1x1x4x72xf32>
    %2 = vector.shape_cast %1 : vector<1x1x4x72xf32> to vector<4x72xf32>
    %c0_5 = arith.constant 0 : index
    %c1 = arith.constant 1 : index
    %c0_6 = arith.constant 0 : index
    %c0_7 = arith.constant 0 : index
    %3 = vector.load %arg1[%c0_5, %c1, %c0_6, %c0_7] : memref<1x4x5x72xf32, #tpu.memory_space<vmem>>, vector<1x1x4x72xf32>
    %4 = vector.shape_cast %3 : vector<1x1x4x72xf32> to vector<4x72xf32>
    %c0_8 = arith.constant 0 : index
    %c2 = arith.constant 2 : index
    %c0_9 = arith.constant 0 : index
    %c0_10 = arith.constant 0 : index
    %5 = vector.load %arg1[%c0_8, %c2, %c0_9, %c0_10] : memref<1x4x5x72xf32, #tpu.memory_space<vmem>>, vector<1x1x4x72xf32>
    %6 = vector.shape_cast %5 : vector<1x1x4x72xf32> to vector<4x72xf32>
    %c0_11 = arith.constant 0 : index
    %c3 = arith.constant 3 : index
    %c0_12 = arith.constant 0 : index
    %c0_13 = arith.constant 0 : index
    %7 = vector.load %arg1[%c0_11, %c3, %c0_12, %c0_13] : memref<1x4x5x72xf32, #tpu.memory_space<vmem>>, vector<1x1x4x72xf32>
    %8 = vector.shape_cast %7 : vector<1x1x4x72xf32> to vector<4x72xf32>
    %c0_14 = arith.constant 0 : index
    %c0_15 = arith.constant 0 : index
    %c1_16 = arith.constant 1 : index
    %c0_17 = arith.constant 0 : index
    %9 = vector.load %arg1[%c0_14, %c0_15, %c1_16, %c0_17] : memref<1x4x5x72xf32, #tpu.memory_space<vmem>>, vector<1x1x4x72xf32>
    %10 = vector.shape_cast %9 : vector<1x1x4x72xf32> to vector<4x72xf32>
    %c0_18 = arith.constant 0 : index
    %c0_19 = arith.constant 0 : index
    %c0_20 = arith.constant 0 : index
    %11 = vector.load %arg2[%c0_18, %c0_19, %c0_20] : memref<3x72x256xbf16, #tpu.memory_space<vmem>>, vector<1x72x256xbf16>
    %12 = vector.shape_cast %11 : vector<1x72x256xbf16> to vector<72x256xbf16>
    %13 = arith.truncf %2 : vector<4x72xf32> to vector<4x72xbf16>
    %cst = arith.constant dense<0.000000e+00> : vector<4x256xf32>
    %14 = tpu.matmul %13, %12, %cst {dimension_numbers = #tpu.dot_dimension_numbers<[1], [0], [0], [1], [0, 0, 1, 1], [], []>} : vector<4x72xbf16>, vector<72x256xbf16>, vector<4x256xf32> -> vector<4x256xf32>
    %c1_21 = arith.constant 1 : index
    %c0_22 = arith.constant 0 : index
    %c0_23 = arith.constant 0 : index
    %15 = vector.load %arg2[%c1_21, %c0_22, %c0_23] : memref<3x72x256xbf16, #tpu.memory_space<vmem>>, vector<1x72x256xbf16>
    %16 = vector.shape_cast %15 : vector<1x72x256xbf16> to vector<72x256xbf16>
    %17 = arith.truncf %4 : vector<4x72xf32> to vector<4x72xbf16>
    %cst_24 = arith.constant dense<0.000000e+00> : vector<4x256xf32>
    %18 = tpu.matmul %17, %16, %cst_24 {dimension_numbers = #tpu.dot_dimension_numbers<[1], [0], [0], [1], [0, 0, 1, 1], [], []>} : vector<4x72xbf16>, vector<72x256xbf16>, vector<4x256xf32> -> vector<4x256xf32>
    %19 = arith.addf %14, %18 : vector<4x256xf32>
    %c2_25 = arith.constant 2 : index
    %c0_26 = arith.constant 0 : index
    %c0_27 = arith.constant 0 : index
    %20 = vector.load %arg2[%c2_25, %c0_26, %c0_27] : memref<3x72x256xbf16, #tpu.memory_space<vmem>>, vector<1x72x256xbf16>
    %21 = vector.shape_cast %20 : vector<1x72x256xbf16> to vector<72x256xbf16>
    %22 = arith.truncf %6 : vector<4x72xf32> to vector<4x72xbf16>
    %cst_28 = arith.constant dense<0.000000e+00> : vector<4x256xf32>
    %23 = tpu.matmul %22, %21, %cst_28 {dimension_numbers = #tpu.dot_dimension_numbers<[1], [0], [0], [1], [0, 0, 1, 1], [], []>} : vector<4x72xbf16>, vector<72x256xbf16>, vector<4x256xf32> -> vector<4x256xf32>
    %24 = arith.addf %19, %23 : vector<4x256xf32>
    %25 = vector.broadcast %0 : vector<1x256xf32> to vector<4x256xf32>
    %26 = arith.addf %24, %25 : vector<4x256xf32>
    %cst_29 = arith.constant 0.000000e+00 : f32
    %27 = vector.broadcast %cst_29 : f32 to vector<4x256xf32>
    %28 = arith.maximumf %26, %27 : vector<4x256xf32>
    %c0_30 = arith.constant 0 : index
    %c0_31 = arith.constant 0 : index
    %c0_32 = arith.constant 0 : index
    %29 = vector.load %arg2[%c0_30, %c0_31, %c0_32] : memref<3x72x256xbf16, #tpu.memory_space<vmem>>, vector<1x72x256xbf16>
    %30 = vector.shape_cast %29 : vector<1x72x256xbf16> to vector<72x256xbf16>
    %31 = arith.truncf %6 : vector<4x72xf32> to vector<4x72xbf16>
    %cst_33 = arith.constant dense<0.000000e+00> : vector<4x256xf32>
    %32 = tpu.matmul %31, %30, %cst_33 {dimension_numbers = #tpu.dot_dimension_numbers<[1], [0], [0], [1], [0, 0, 1, 1], [], []>} : vector<4x72xbf16>, vector<72x256xbf16>, vector<4x256xf32> -> vector<4x256xf32>
    %c1_34 = arith.constant 1 : index
    %c0_35 = arith.constant 0 : index
    %c0_36 = arith.constant 0 : index
    %33 = vector.load %arg2[%c1_34, %c0_35, %c0_36] : memref<3x72x256xbf16, #tpu.memory_space<vmem>>, vector<1x72x256xbf16>
    %34 = vector.shape_cast %33 : vector<1x72x256xbf16> to vector<72x256xbf16>
    %35 = arith.truncf %8 : vector<4x72xf32> to vector<4x72xbf16>
    %cst_37 = arith.constant dense<0.000000e+00> : vector<4x256xf32>
    %36 = tpu.matmul %35, %34, %cst_37 {dimension_numbers = #tpu.dot_dimension_numbers<[1], [0], [0], [1], [0, 0, 1, 1], [], []>} : vector<4x72xbf16>, vector<72x256xbf16>, vector<4x256xf32> -> vector<4x256xf32>
    %37 = arith.addf %32, %36 : vector<4x256xf32>
    %c2_38 = arith.constant 2 : index
    %c0_39 = arith.constant 0 : index
    %c0_40 = arith.constant 0 : index
    %38 = vector.load %arg2[%c2_38, %c0_39, %c0_40] : memref<3x72x256xbf16, #tpu.memory_space<vmem>>, vector<1x72x256xbf16>
    %39 = vector.shape_cast %38 : vector<1x72x256xbf16> to vector<72x256xbf16>
    %40 = arith.truncf %10 : vector<4x72xf32> to vector<4x72xbf16>
    %cst_41 = arith.constant dense<0.000000e+00> : vector<4x256xf32>
    %41 = tpu.matmul %40, %39, %cst_41 {dimension_numbers = #tpu.dot_dimension_numbers<[1], [0], [0], [1], [0, 0, 1, 1], [], []>} : vector<4x72xbf16>, vector<72x256xbf16>, vector<4x256xf32> -> vector<4x256xf32>
    %42 = arith.addf %37, %41 : vector<4x256xf32>
    %43 = vector.broadcast %0 : vector<1x256xf32> to vector<4x256xf32>
    %44 = arith.addf %42, %43 : vector<4x256xf32>
    %cst_42 = arith.constant 0.000000e+00 : f32
    %45 = vector.broadcast %cst_42 : f32 to vector<4x256xf32>
    %46 = arith.maximumf %44, %45 : vector<4x256xf32>
    %c1_43 = arith.constant 1 : index
    %c0_44 = arith.constant 0 : index
    %c0_45 = arith.constant 0 : index
    %47 = vector.load %arg4[%c1_43, %c0_44, %c0_45] : memref<3x256x256xbf16, #tpu.memory_space<vmem>>, vector<1x256x256xbf16>
    %48 = vector.shape_cast %47 : vector<1x256x256xbf16> to vector<256x256xbf16>
    %49 = arith.truncf %28 : vector<4x256xf32> to vector<4x256xbf16>
    %cst_46 = arith.constant dense<0.000000e+00> : vector<4x256xf32>
    %50 = tpu.matmul %49, %48, %cst_46 {dimension_numbers = #tpu.dot_dimension_numbers<[1], [0], [0], [1], [0, 0, 1, 1], [], []>} : vector<4x256xbf16>, vector<256x256xbf16>, vector<4x256xf32> -> vector<4x256xf32>
    %c2_47 = arith.constant 2 : index
    %c0_48 = arith.constant 0 : index
    %c0_49 = arith.constant 0 : index
    %51 = vector.load %arg4[%c2_47, %c0_48, %c0_49] : memref<3x256x256xbf16, #tpu.memory_space<vmem>>, vector<1x256x256xbf16>
    %52 = vector.shape_cast %51 : vector<1x256x256xbf16> to vector<256x256xbf16>
    %53 = arith.truncf %46 : vector<4x256xf32> to vector<4x256xbf16>
    %cst_50 = arith.constant dense<0.000000e+00> : vector<4x256xf32>
    %54 = tpu.matmul %53, %52, %cst_50 {dimension_numbers = #tpu.dot_dimension_numbers<[1], [0], [0], [1], [0, 0, 1, 1], [], []>} : vector<4x256xbf16>, vector<256x256xbf16>, vector<4x256xf32> -> vector<4x256xf32>
    %c0_51 = arith.constant 0 : index
    %c0_52 = arith.constant 0 : index
    %c0_53 = arith.constant 0 : index
    %55 = vector.load %arg4[%c0_51, %c0_52, %c0_53] : memref<3x256x256xbf16, #tpu.memory_space<vmem>>, vector<1x256x256xbf16>
    %56 = vector.shape_cast %55 : vector<1x256x256xbf16> to vector<256x256xbf16>
    %57 = arith.truncf %46 : vector<4x256xf32> to vector<4x256xbf16>
    %cst_54 = arith.constant dense<0.000000e+00> : vector<4x256xf32>
    %58 = tpu.matmul %57, %56, %cst_54 {dimension_numbers = #tpu.dot_dimension_numbers<[1], [0], [0], [1], [0, 0, 1, 1], [], []>} : vector<4x256xbf16>, vector<256x256xbf16>, vector<4x256xf32> -> vector<4x256xf32>
    %59 = tpu.iota {dimensions = array<i32: 0>} : vector<4x4xi32>
    %60 = tpu.iota {dimensions = array<i32: 1>} : vector<4x4xi32>
    %c1_i32 = arith.constant 1 : i32
    %61 = vector.broadcast %c1_i32 : i32 to vector<4x4xi32>
    %62 = arith.addi %60, %61 : vector<4x4xi32>
    %63 = arith.cmpi eq, %59, %62 : vector<4x4xi32>
    %64 = arith.extui %63 : vector<4x4xi1> to vector<4x4xi32>
    %65 = arith.sitofp %64 : vector<4x4xi32> to vector<4x4xf32>
    %cst_55 = arith.constant dense<0.000000e+00> : vector<4x256xf32>
    %66 = tpu.matmul %65, %58, %cst_55 {dimension_numbers = #tpu.dot_dimension_numbers<[1], [0], [0], [1], [0, 0, 1, 1], [], []>} : vector<4x4xf32>, vector<4x256xf32>, vector<4x256xf32> -> vector<4x256xf32>
    %67 = arith.addf %66, %50 : vector<4x256xf32>
    %68 = arith.addf %67, %54 : vector<4x256xf32>
    %c0_56 = arith.constant 0 : index
    %c0_57 = arith.constant 0 : index
    %69 = vector.load %arg5[%c0_56, %c0_57] : memref<1x256xf32, #tpu.memory_space<vmem>>, vector<1x256xf32>
    %70 = vector.broadcast %69 : vector<1x256xf32> to vector<4x256xf32>
    %71 = arith.addf %68, %70 : vector<4x256xf32>
    %cst_58 = arith.constant 0.000000e+00 : f32
    %72 = vector.broadcast %cst_58 : f32 to vector<4x256xf32>
    %73 = arith.maximumf %71, %72 : vector<4x256xf32>
    %c0_59 = arith.constant 0 : index
    %c0_60 = arith.constant 0 : index
    %c0_61 = arith.constant 0 : index
    %74 = vector.load %arg6[%c0_59, %c0_60, %c0_61] : memref<1x4x256xf32, #tpu.memory_space<vmem>>, vector<1x4x256xf32>
    %75 = vector.shape_cast %74 : vector<1x4x256xf32> to vector<4x256xf32>
    %76 = vector.shape_cast %73 : vector<4x256xf32> to vector<1x4x256xf32>
    tpu.vector_store %arg6[%c0_59, %c0_60, %c0_61], %76 {strides = array<i32>} : memref<1x4x256xf32, #tpu.memory_space<vmem>>, vector<1x4x256xf32>,
    return
  }
  func.func @transform_0(%arg0: i32) -> (i32, i32, i32, i32) {
    %c0_i32 = arith.constant 0 : i32
    %c0_i32_0 = arith.constant 0 : i32
    %c0_i32_1 = arith.constant 0 : i32
    %c0_i32_2 = arith.constant 0 : i32
    return %arg0, %c0_i32, %c0_i32_0, %c0_i32_1 : i32, i32, i32, i32
  }
  func.func @transform_1(%arg0: i32) -> (i32, i32, i32) {
    %c0_i32 = arith.constant 0 : i32
    %c0_i32_0 = arith.constant 0 : i32
    %c0_i32_1 = arith.constant 0 : i32
    %c0_i32_2 = arith.constant 0 : i32
    return %c0_i32, %c0_i32_0, %c0_i32_1 : i32, i32, i32
  }
  func.func @transform_2(%arg0: i32) -> (i32, i32) {
    %c0_i32 = arith.constant 0 : i32
    %c0_i32_0 = arith.constant 0 : i32
    %c0_i32_1 = arith.constant 0 : i32
    return %c0_i32, %c0_i32_0 : i32, i32
  }
  func.func @transform_3(%arg0: i32) -> (i32, i32, i32) {
    %c0_i32 = arith.constant 0 : i32
    %c0_i32_0 = arith.constant 0 : i32
    %c0_i32_1 = arith.constant 0 : i32
    %c0_i32_2 = arith.constant 0 : i32
    return %c0_i32, %c0_i32_0, %c0_i32_1 : i32, i32, i32
  }
  func.func @transform_4(%arg0: i32) -> (i32, i32) {
    %c0_i32 = arith.constant 0 : i32
    %c0_i32_0 = arith.constant 0 : i32
    %c0_i32_1 = arith.constant 0 : i32
    return %c0_i32, %c0_i32_0 : i32, i32
  }
  func.func @transform_5(%arg0: i32) -> (i32, i32, i32) {
    %c0_i32 = arith.constant 0 : i32
    %c0_i32_0 = arith.constant 0 : i32
    %c0_i32_1 = arith.constant 0 : i32
    return %arg0, %c0_i32, %c0_i32_0 : i32, i32, i32
  }
}

</mosaic_0001>

<bundles_post_ra>
// kernel: a_call__.1
= control target key start
LH: loop header
LB: loop body
LE: loop exit
PB: predicated region body
PF: predicated region fallthrough
CT: control target
= control target key end

     0   :  { %10 = vsyncpa [#allocation3], 0  ;;  %s2307_s18 = smov 0   ;;  %s3046_s0 = inlined_call_operand.vmem [shape: f32[2,4,5,72], index: 0, kind: input, shape index: {}]   ;;  %s3047_s1 = inlined_call_operand.hbm [shape: bf16[3,72,256], index: 1, kind: input, shape index: {}]   ;;  %s3048_s2 = inlined_call_operand.vmem [shape: f32[1,256], index: 2, kind: input, shape index: {}]   ;;  %s3049_s3 = inlined_call_operand.vmem [shape: bf16[3,256,256], index: 3, kind: input, shape index: {}]   ;;  %s3050_s4 = inlined_call_operand.vmem [shape: f32[1,256], index: 4, kind: input, shape index: {}]   ;;  %s3051_s5 = inlined_call_operand.vmem [shape: f32[2,4,256], index: 5, kind: output, shape index: {}]  }
   0x1 LB: > { %s168_s21 = sshll.u32 %s3047_s1, 4  ;;  %s2316_s22 = sadd.s32 4294967295, %s2271_s18   ;;  %s2271_s18 = sphi %s2307_s18, %s16_s18   ;;  %s169_s21 = int_to_ptr.hbm [resolvable:$true] %s168_s21 }
   0x2   : > { %p1512_p0 = scmp.ge.s32.totalorder %s2271_s18, 1  ;;  %p157_p1 = scmp.lt.s32.totalorder %s2271_s18, 3 }
   0x3   : > { %p2217_p2 = scmp.eq.s32.totalorder %s2316_s22, 0  ;;  %s2273_s23 = smov [#allocation2]  }
   0x4   : > { %p158_p3 = pnand %p1512_p0, %p157_p1  ;;  %s170_s24 = sshll.u32 %s2273_s23, 4  ;;  %s171_s24 = int_to_ptr.vmem [resolvable:$true] %s170_s24 }
   0x5   : > { %s2274_s25 = smov 128   ;;  %s2275_s26 = smov 8  }
   0x6   : > { %p2213_p4 = pneg %p158_p3  ;;  %203 = sbr.rel (%p158_p3) target bundleno = 509 (0x1fd), region = 40 }
   0x8   : > { %p2214_p5 = pnand %p2217_p2, %p2213_p4 }
   0xa   : > { %2216 = dma.hbm_to_vmem [thread:$0]  (!%p2214_p5), %s169_s21, 3456, %s171_s24, [#allocation3], %s2274_s25, %s2274_s25, %s2275_s26  }
   0xb   : > { %2266 = dma.done.wait (%p2217_p2), [#allocation3], 3456  }
   0xc   : > { %2268 = vsyncadd (%p2217_p2), [#allocation3], 4294963840  ;;  %v271_v0 = vld [vmem:[#allocation2 + $0x88] sm:$0xff]  ;;  %v260_v1 = vld [vmem:[#allocation2 + $0x40] sm:$0xff]  ;;  %vm322_vm0 = vcmask 1043456   ;;  %p232_p6 = scmp.lt.s32.totalorder %s2316_s22, 1 }
   0xd   : > { %v298_v2 = vunpack.c.l.b16 %v271_v0  ;;  %v299_v3 = vunpack.c.h.b16 %v271_v0  ;;  %v380_v4 = vunpack.c.l.b16 %v260_v1  ;;  %v381_v5 = vunpack.c.h.b16 %v260_v1  ;;  %v1550_v6 = vld [vmem:[#allocation2 + $0x78] sm:$0xf]  ;;  %v2104_v7 = vld [vmem:[#allocation2 + $0x7c] sm:$0xf0]  ;;  %v2103_v12 = vld [vmem:[#allocation2 + $0x7c] sm:$0xf] }
   0xe   : > { %v1552_v13 = vld [vmem:[#allocation2 + $0x80] sm:$0xf0]  ;;  %v1584_v14 = vld [vmem:[#allocation2 + $0x30] sm:$0xf]  ;;  %v2096_v15 = vld [vmem:[#allocation2 + $0x34] sm:$0xf0]  ;;  %v2336_v22 = vor.u32 %v2104_v7, %v1550_v6 }
   0xf   : > { %v308_v8 = vpack.c.b16 %v298_v2, %v298_v2  ;;  %v309_v9 = vpack.c.b16 %v299_v3, %v299_v3  ;;  %v390_v10 = vpack.c.b16 %v380_v4, %v380_v4  ;;  %v391_v11 = vpack.c.b16 %v381_v5, %v381_v5  ;;  %v2095_v16 = vld [vmem:[#allocation2 + $0x34] sm:$0xf]  ;;  %v1586_v17 = vld [vmem:[#allocation2 + $0x38] sm:$0xf0]  ;;  %v1542_v24 = vld [vmem:[#allocation2 + $0x68] sm:$0xf] }
  0x10   : > { %v2338_v23 = vor.u32 %v2103_v12, %v1552_v13  ;;  %v2102_v25 = vld [vmem:[#allocation2 + $0x6c] sm:$0xf0]  ;;  %v2342_v26 = vor.u32 %v2096_v15, %v1584_v14  ;;  %v2344_v27 = vor.u32 %v2095_v16, %v1586_v17  ;;  %v2101_v28 = vld [vmem:[#allocation2 + $0x6c] sm:$0xf]  ;;  %v1544_v29 = vld [vmem:[#allocation2 + $0x70] sm:$0xf0] }
  0x11   : > { %v2322_v18 = vsel %vm322_vm0, %v308_v8, 0  ;;  %v2325_v19 = vsel %vm322_vm0, %v309_v9, 0  ;;  %v2328_v20 = vsel %vm322_vm0, %v390_v10, 0  ;;  %v2331_v21 = vsel %vm322_vm0, %v391_v11, 0  ;;  %v1576_v30 = vld [vmem:[#allocation2 + $0x20] sm:$0xf] }
  0x12   : > { %332 = vmatpush.bf16.msra.mxu0 %v2322_v18  ;;  %345 = vmatpush.bf16.msra.mxu1 %v2325_v19  ;;  %v2094_v31 = vld [vmem:[#allocation2 + $0x24] sm:$0xf0]  ;;  %v2093_v32 = vld [vmem:[#allocation2 + $0x24] sm:$0xf]  ;;  %v1578_v33 = vld [vmem:[#allocation2 + $0x28] sm:$0xf0]  ;;  %v2353_v34 = vor.u32 %v2102_v25, %v1542_v24  ;;  %v2355_v35 = vor.u32 %v2101_v28, %v1544_v29 }
  0x13   : > { %412 = vmatpush.bf16.msra.mxu2 %v2328_v20  ;;  %425 = vmatpush.bf16.msra.mxu3 %v2331_v21  ;;  %s3053_s22 = smov (!%p232_p6, %s2316_s22), 1  ;;  %v1534_v36 = vld [vmem:[#allocation2 + $0x58] sm:$0xf]  ;;  %v2100_v37 = vld [vmem:[#allocation2 + $0x5c] sm:$0xf0]  ;;  %v2359_v39 = vor.u32 %v2094_v31, %v1576_v30  ;;  %v2361_v40 = vor.u32 %v2093_v32, %v1578_v33  ;;  %v444_v46 = vld [vmem:[#allocation2 + $0xd0] sm:$0xff] }
  0x14   : > { %v2099_v38 = vld [vmem:[#allocation2 + $0x5c] sm:$0xf]  ;;  %v1536_v41 = vld [vmem:[#allocation2 + $0x60] sm:$0xf0]  ;;  %v1568_v42 = vld [vmem:[#allocation2 + $0x10] sm:$0xf]  ;;  %v471_v47 = vunpack.c.l.b16 %v444_v46  ;;  %v472_v48 = vunpack.c.h.b16 %v444_v46  ;;  %v2366_v49 = vor.u32 %v2100_v37, %v1534_v36 }
  0x15   : > { %v2092_v43 = vld [vmem:[#allocation2 + $0x14] sm:$0xf0]  ;;  %v2091_v44 = vld [vmem:[#allocation2 + $0x14] sm:$0xf]  ;;  %v1570_v45 = vld [vmem:[#allocation2 + $0x18] sm:$0xf0]  ;;  %v2368_v50 = vor.u32 %v2099_v38, %v1536_v41 }
  0x16   : > { %333 = vmatpush.bf16.msra.mxu0 %v2336_v22  ;;  %346 = vmatpush.bf16.msra.mxu1 %v2338_v23  ;;  %s2087_s27 = sshll.u32 %s3053_s22, 5  ;;  %v1526_v51 = vld [vmem:[#allocation2 + $0x48] sm:$0xf]  ;;  %v2098_v52 = vld [vmem:[#allocation2 + $0x4c] sm:$0xf0]  ;;  %v2372_v53 = vor.u32 %v2092_v43, %v1568_v42  ;;  %v2374_v54 = vor.u32 %v2091_v44, %v1570_v45  ;;  %v481_v61 = vpack.c.b16 %v471_v47, %v471_v47  ;;  %vm318_vm1 = vcmask 588800  }
  0x17   : > { %413 = vmatpush.bf16.msra.mxu2 %v2342_v26  ;;  %426 = vmatpush.bf16.msra.mxu3 %v2344_v27  ;;  %v2097_v55 = vld [vmem:[#allocation2 + $0x4c] sm:$0xf]  ;;  %v1528_v56 = vld [vmem:[#allocation2 + $0x50] sm:$0xf0]  ;;  %v1560_v57 = vld [vmem:[#allocation2] sm:$0xf]  ;;  %s2379_s30 = scalar_lea.vmem %s3046_s0, %s2087_s27  ;;  %v482_v62 = vpack.c.b16 %v472_v48, %v472_v48  ;;  %v2383_v63 = vor.u32 %v2098_v52, %v1526_v51 }
  0x18   : > { %v2090_v58 = vld [vmem:[#allocation2 + $0x4] sm:$0xf0]  ;;  %v2089_v59 = vld [vmem:[#allocation2 + $0x4] sm:$0xf]  ;;  %v1562_v60 = vld [vmem:[#allocation2 + $0x8] sm:$0xf0]  ;;  %v2385_v0 = vor.u32 %v2097_v55, %v1528_v56 }
  0x19   : > { %v2389_v1 = vor.u32 %v2090_v58, %v1560_v57  ;;  %v2391_v2 = vor.u32 %v2089_v59, %v1562_v60  ;;  %v1521_v3 = vld [vmem:[%s2379_s30 + $0x8] sm:$0xf]  ;;  %v244_v4 = vld [vmem:[%s2379_s30] sm:$0xf]  ;;  %v495_v7 = vsel %vm322_vm0, %v481_v61, 0  ;;  %v498_v8 = vsel %vm322_vm0, %v482_v62, 0 }
  0x1a   : > { %334 = vmatpush.bf16.msra.mxu0 %v2353_v34  ;;  %347 = vmatpush.bf16.msra.mxu1 %v2355_v35  ;;  %v1618_v5 = vld [vmem:[#allocation2 + $0xc0] sm:$0xf]  ;;  %v2112_v6 = vld [vmem:[#allocation2 + $0xc4] sm:$0xf0]  ;;  %v2111_v9 = vld [vmem:[#allocation2 + $0xc4] sm:$0xf]  ;;  %v272_v11 = vpack.c.bf16 %v1521_v3, %v1521_v3  ;;  %v261_v12 = vpack.c.bf16 %v244_v4, %v244_v4 }
  0x1b   : > { %414 = vmatpush.bf16.msra.mxu2 %v2359_v39  ;;  %427 = vmatpush.bf16.msra.mxu3 %v2361_v40  ;;  %v1620_v10 = vld [vmem:[#allocation2 + $0xc8] sm:$0xf0]  ;;  %v1619_v13 = vor.u32 %v2112_v6, %v1618_v5  ;;  %v1610_v15 = vld [vmem:[#allocation2 + $0xb0] sm:$0xf]  ;;  %v2110_v16 = vld [vmem:[#allocation2 + $0xb4] sm:$0xf0] }
  0x1c   : > { %v1623_v14 = vor.u32 %v2111_v9, %v1620_v10  ;;  %v2109_v17 = vld [vmem:[#allocation2 + $0xb4] sm:$0xf]  ;;  %v1612_v24 = vld [vmem:[#allocation2 + $0xb8] sm:$0xf0]  ;;  %v1611_v25 = vor.u32 %v2110_v16, %v1610_v15  ;;  %v1602_v29 = vld [vmem:[#allocation2 + $0xa0] sm:$0xf] }
  0x1d   : > { %v1615_v28 = vor.u32 %v2109_v17, %v1612_v24  ;;  %v1604_v30 = vld [vmem:[#allocation2 + $0xa8] sm:$0xf0]  ;;  %v1594_v33 = vld [vmem:[#allocation2 + $0x90] sm:$0xf]  ;;  %v2106_v36 = vld [vmem:[#allocation2 + $0x94] sm:$0xf0] }
  0x1e   : > { %335 = vmatpush.bf16.msra.mxu0 %v2366_v49  ;;  %348 = vmatpush.bf16.msra.mxu1 %v2368_v50  ;;  %v2105_v37 = vld [vmem:[#allocation2 + $0x94] sm:$0xf]  ;;  %v1596_v38 = vld [vmem:[#allocation2 + $0x98] sm:$0xf0]  ;;  %v1522_v41 = vld [vmem:[%s2379_s30 + $0x10] sm:$0xf] }
  0x1f   : > { %415 = vmatpush.bf16.msra.mxu2 %v2372_v53  ;;  %428 = vmatpush.bf16.msra.mxu3 %v2374_v54  ;;  %v1523_v42 = vld [vmem:[%s2379_s30 + $0x18] sm:$0xf]  ;;  %v445_v43 = vpack.c.bf16 %v1522_v41, %v1522_v41  ;;  %v2143_v46 = vld [vmem:[%s3049_s3 + $0x1f4] sm:$0xf]  ;;  %v1788_v47 = vld [vmem:[%s3049_s3 + $0x1f8] sm:$0xf0] }
  0x20   : > { %v1714_v48 = vld [vmem:[%s3049_s3 + $0x160] sm:$0xf]  ;;  %v2142_v51 = vld [vmem:[%s3049_s3 + $0x1e4] sm:$0xf0]  ;;  %v2125_v55 = vld [vmem:[%s3049_s3 + $0x164] sm:$0xf] }
  0x21   : > { %v1716_v56 = vld [vmem:[%s3049_s3 + $0x168] sm:$0xf0]  ;;  %v2141_v59 = vld [vmem:[%s3049_s3 + $0x1e4] sm:$0xf]  ;;  %v1706_v61 = vld [vmem:[%s3049_s3 + $0x150] sm:$0xf] }
  0x22   : > { %336 = vmatpush.bf16.msra.mxu0 %v2383_v63  ;;  %349 = vmatpush.bf16.msra.mxu1 %v2385_v0  ;;  %v1780_v60 = vld [vmem:[%s3049_s3 + $0x1e8] sm:$0xf0]  ;;  %v2124_v62 = vld [vmem:[%s3049_s3 + $0x154] sm:$0xf0]  ;;  %v2123_v3 = vld [vmem:[%s3049_s3 + $0x154] sm:$0xf] }
  0x23   : > { %416 = vmatpush.bf16.msra.mxu2 %v2389_v1  ;;  %429 = vmatpush.bf16.msra.mxu3 %v2391_v2  ;;  %v1708_v4 = vld [vmem:[%s3049_s3 + $0x158] sm:$0xf0]  ;;  %v1707_v5 = vor.u32 %v2124_v62, %v1706_v61  ;;  %v1698_v9 = vld [vmem:[%s3049_s3 + $0x140] sm:$0xf]  ;;  %v2122_v10 = vld [vmem:[%s3049_s3 + $0x144] sm:$0xf0] }
  0x24   : > { %v2121_v15 = vld [vmem:[%s3049_s3 + $0x144] sm:$0xf]  ;;  %v1700_v16 = vld [vmem:[%s3049_s3 + $0x148] sm:$0xf0]  ;;  %v1699_v17 = vor.u32 %v2122_v10, %v1698_v9  ;;  %v1682_v41 = vld [vmem:[%s3049_s3 + $0x120] sm:$0xf] }
  0x25   : > { %1556 = vmatmul.msk.bf16.vlgmr.msra.gmra.mxu0 %vm318_vm1, %v272_v11  ;;  %1557 = vmatmul.msk.bf16.vlgmr.msra.gmra.mxu1 %vm318_vm1, %v272_v11  ;;  %v1762_v11 = vld [vmem:[%s3049_s3 + $0x1c0] sm:$0xf]  ;;  %v2130_v62 = vld [vmem:[%s3049_s3 + $0x184] sm:$0xf0]  ;;  %v1946_v10 = vld [vmem:[%s3049_s3 + $0x2f0] sm:$0xf] }
  0x26   : > { %503 = vmatpush.bf16.msrb.mxu0 %v495_v7  ;;  %516 = vmatpush.bf16.msrb.mxu1 %v498_v8  ;;  %v1730_v61 = vld [vmem:[%s3049_s3 + $0x180] sm:$0xf]  ;;  %vm1375_vm3 = vcmask 31744   ;;  %s2088_s28 = sshll.u32 %s3053_s22, 3 }
  0x27   : > { %544 = vmatpush.bf16.msrb.mxu2 %v2322_v18  ;;  %557 = vmatpush.bf16.msrb.mxu3 %v2325_v19  ;;  %v2108_v18 = vld [vmem:[#allocation2 + $0xa4] sm:$0xf0]  ;;  %v2107_v19 = vld [vmem:[#allocation2 + $0xa4] sm:$0xf]  ;;  %s241_s6 = scalar_lea.vmem %s3051_s5, %s2088_s28 }
  0x28   : > { %1590 = vmatmul.msk.bf16.vlgmr.msra.gmra.mxu2 %vm318_vm1, %v261_v12  ;;  %1591 = vmatmul.msk.bf16.vlgmr.msra.gmra.mxu3 %vm318_vm1, %v261_v12  ;;  %v1603_v31 = vor.u32 %v2108_v18, %v1602_v29  ;;  %v1607_v32 = vor.u32 %v2107_v19, %v1604_v30  ;;  %v2138_v12 = vld [vmem:[%s3049_s3 + $0x1c4] sm:$0xf0]  ;;  %v1690_v29 = vld [vmem:[%s3049_s3 + $0x130] sm:$0xf]  ;;  %v2120_v18 = vld [vmem:[%s3049_s3 + $0x134] sm:$0xf0] }
  0x29   : > { %v1763_v24 = vor.u32 %v2138_v12, %v1762_v11  ;;  %v1754_v19 = vld [vmem:[%s3049_s3 + $0x1b0] sm:$0xf]  ;;  %v2136_v30 = vld [vmem:[%s3049_s3 + $0x1b4] sm:$0xf0]  ;;  %v2159_v12 = vld [vmem:[%s3049_s3 + $0x274] sm:$0xf] }
  0x2a   : > { %504 = vmatpush.bf16.msrb.mxu0 %v1619_v13  ;;  %517 = vmatpush.bf16.msrb.mxu1 %v1623_v14  ;;  %v2176_v11 = vld [vmem:[%s3049_s3 + $0x2f4] sm:$0xf0] }
  0x2b   : > { %545 = vmatpush.bf16.msrb.mxu2 %v2336_v22  ;;  %558 = vmatpush.bf16.msrb.mxu3 %v2338_v23  ;;  %v1595_v22 = vor.u32 %v2106_v36, %v1594_v33  ;;  %v1599_v23 = vor.u32 %v2105_v37, %v1596_v38  ;;  %v2119_v33 = vld [vmem:[%s3049_s3 + $0x134] sm:$0xf]  ;;  %v1692_v36 = vld [vmem:[%s3049_s3 + $0x138] sm:$0xf0]  ;;  %v1691_v37 = vor.u32 %v2120_v18, %v1690_v29  ;;  %v1938_v29 = vld [vmem:[%s3049_s3 + $0x2e0] sm:$0xf] }
  0x2c   : > { %v1755_v38 = vor.u32 %v2136_v30, %v1754_v19  ;;  %v2174_v19 = vld [vmem:[%s3049_s3 + $0x2e4] sm:$0xf0]  ;;  %v2157_v30 = vld [vmem:[%s3049_s3 + $0x264] sm:$0xf] }
  0x2e   : > { %505 = vmatpush.bf16.msrb.mxu0 %v1611_v25  ;;  %518 = vmatpush.bf16.msrb.mxu1 %v1615_v28 }
  0x2f   : > { %546 = vmatpush.bf16.msrb.mxu2 %v2353_v34  ;;  %559 = vmatpush.bf16.msrb.mxu3 %v2355_v35  ;;  %v537_v34 = vpack.c.bf16 %v1523_v42, %v1523_v42  ;;  %v251_v35 = vld [vmem:[%s2379_s30 + $0x1] sm:$0xf]  ;;  %v2118_v42 = vld [vmem:[%s3049_s3 + $0x124] sm:$0xf0] }
  0x30   : > { %v593_v52 = vpack.c.bf16 %v251_v35, %v251_v35 }
  0x32   : > { %506 = vmatpush.bf16.msrb.mxu0 %v1603_v31  ;;  %519 = vmatpush.bf16.msrb.mxu1 %v1607_v32 }
  0x33   : > { %547 = vmatpush.bf16.msrb.mxu2 %v2366_v49  ;;  %560 = vmatpush.bf16.msrb.mxu3 %v2368_v50  ;;  %v2126_v49 = vld [vmem:[%s3049_s3 + $0x164] sm:$0xf0]  ;;  %v1778_v50 = vld [vmem:[%s3049_s3 + $0x1e0] sm:$0xf] }
  0x34   : > { %v1715_v57 = vor.u32 %v2126_v49, %v1714_v48  ;;  %v1779_v58 = vor.u32 %v2142_v51, %v1778_v50  ;;  %v2116_v48 = vld [vmem:[%s3049_s3 + $0x114] sm:$0xf0]  ;;  %v1738_v49 = vld [vmem:[%s3049_s3 + $0x190] sm:$0xf] }
  0x35   : > { %v2132_v51 = vld [vmem:[%s3049_s3 + $0x194] sm:$0xf0] }
  0x36   : > { %507 = vmatpush.bf16.msrb.mxu0 %v1595_v22  ;;  %520 = vmatpush.bf16.msrb.mxu1 %v1599_v23 }
  0x37   : > { %548 = vmatpush.bf16.msrb.mxu2 %v2383_v63  ;;  %561 = vmatpush.bf16.msrb.mxu3 %v2385_v0  ;;  %v1770_v63 = vld [vmem:[%s3049_s3 + $0x1d0] sm:$0xf]  ;;  %v2140_v0 = vld [vmem:[%s3049_s3 + $0x1d4] sm:$0xf0] }
  0x38   : > { %v1771_v6 = vor.u32 %v2140_v0, %v1770_v63  ;;  %v1731_v0 = vor.u32 %v2130_v62, %v1730_v61  ;;  %v1852_v62 = vld [vmem:[%s3049_s3 + $0x238] sm:$0xf0] }
  0x39   : > { %1624 = vmatmul.msk.bf16.vlgmr.msrb.gmra.mxu0 %vm318_vm1, %v445_v43  ;;  %1625 = vmatmul.msk.bf16.vlgmr.msrb.gmra.mxu1 %vm318_vm1, %v445_v43 }
  0x3a   : > { %570 = vmatpush.bf16.msra.mxu0 %v2328_v20  ;;  %583 = vmatpush.bf16.msra.mxu1 %v2331_v21  ;;  %v1722_v20 = vld [vmem:[%s3049_s3 + $0x170] sm:$0xf]  ;;  %v2128_v21 = vld [vmem:[%s3049_s3 + $0x174] sm:$0xf0] }
  0x3b   : > { %600 = vmatpush.bf16.msra.mxu2 %v495_v7  ;;  %613 = vmatpush.bf16.msra.mxu3 %v498_v8  ;;  %v1723_v44 = vor.u32 %v2128_v21, %v1722_v20  ;;  %v2139_v7 = vld [vmem:[%s3049_s3 + $0x1d4] sm:$0xf]  ;;  %v1772_v8 = vld [vmem:[%s3049_s3 + $0x1d8] sm:$0xf0]  ;;  %v1695_v20 = vor.u32 %v2119_v33, %v1692_v36  ;;  %v2173_v36 = vld [vmem:[%s3049_s3 + $0x2e4] sm:$0xf] }
  0x3c   : > { %1626 = vmatmul.msk.bf16.vlgmr.msrb.gmra.mxu2 %vm318_vm1, %v537_v34  ;;  %1627 = vmatmul.msk.bf16.vlgmr.msrb.gmra.mxu3 %vm318_vm1, %v537_v34  ;;  %v2134_v34 = vld [vmem:[%s3049_s3 + $0x1a4] sm:$0xf0] }
  0x3e   : > { %571 = vmatpush.bf16.msra.mxu0 %v2342_v26  ;;  %584 = vmatpush.bf16.msra.mxu1 %v2344_v27  ;;  %v1786_v26 = vld [vmem:[%s3049_s3 + $0x1f0] sm:$0xf]  ;;  %v2144_v27 = vld [vmem:[%s3049_s3 + $0x1f4] sm:$0xf0] }
  0x3f   : > { %601 = vmatpush.bf16.msra.mxu2 %v1619_v13  ;;  %614 = vmatpush.bf16.msra.mxu3 %v1623_v14  ;;  %v1787_v45 = vor.u32 %v2144_v27, %v1786_v26  ;;  %v1711_v13 = vor.u32 %v2123_v3, %v1708_v4  ;;  %v1775_v14 = vor.u32 %v2139_v7, %v1772_v8  ;;  %v2117_v26 = vld [vmem:[%s3049_s3 + $0x124] sm:$0xf]  ;;  %v2160_v7 = vld [vmem:[%s3049_s3 + $0x274] sm:$0xf0] }
  0x40   : > { %v1683_v27 = vor.u32 %v2118_v42, %v1682_v41  ;;  %v2129_v3 = vld [vmem:[%s3049_s3 + $0x184] sm:$0xf]  ;;  %v1930_v41 = vld [vmem:[%s3049_s3 + $0x2d0] sm:$0xf]  ;;  %v2172_v42 = vld [vmem:[%s3049_s3 + $0x2d4] sm:$0xf0] }
  0x42   : > { %572 = vmatpush.bf16.msra.mxu0 %v2359_v39  ;;  %585 = vmatpush.bf16.msra.mxu1 %v2361_v40  ;;  %v2127_v39 = vld [vmem:[%s3049_s3 + $0x174] sm:$0xf]  ;;  %v1724_v40 = vld [vmem:[%s3049_s3 + $0x178] sm:$0xf0] }
  0x43   : > { %602 = vmatpush.bf16.msra.mxu2 %v1611_v25  ;;  %615 = vmatpush.bf16.msra.mxu3 %v1615_v28  ;;  %v2137_v25 = vld [vmem:[%s3049_s3 + $0x1c4] sm:$0xf]  ;;  %v1764_v28 = vld [vmem:[%s3049_s3 + $0x1c8] sm:$0xf0] }
  0x46   : > { %573 = vmatpush.bf16.msra.mxu0 %v2372_v53  ;;  %586 = vmatpush.bf16.msra.mxu1 %v2374_v54  ;;  %v1727_v53 = vor.u32 %v2127_v39, %v1724_v40  ;;  %v1791_v54 = vor.u32 %v2143_v46, %v1788_v47  ;;  %v1684_v39 = vld [vmem:[%s3049_s3 + $0x128] sm:$0xf0]  ;;  %v2133_v40 = vld [vmem:[%s3049_s3 + $0x1a4] sm:$0xf]  ;;  %v1674_v47 = vld [vmem:[%s3049_s3 + $0x110] sm:$0xf] }
  0x47   : > { %603 = vmatpush.bf16.msra.mxu2 %v1603_v31  ;;  %616 = vmatpush.bf16.msra.mxu3 %v1607_v32  ;;  %v1703_v31 = vor.u32 %v2121_v15, %v1700_v16  ;;  %v1767_v32 = vor.u32 %v2137_v25, %v1764_v28  ;;  %v1675_v50 = vor.u32 %v2116_v48, %v1674_v47  ;;  %v2175_v15 = vld [vmem:[%s3049_s3 + $0x2f4] sm:$0xf]  ;;  %v1948_v16 = vld [vmem:[%s3049_s3 + $0x2f8] sm:$0xf0]  ;;  %v1874_v25 = vld [vmem:[%s3049_s3 + $0x260] sm:$0xf] }
  0x48   : > { %v2158_v28 = vld [vmem:[%s3049_s3 + $0x264] sm:$0xf0]  ;;  %v2153_v48 = vld [vmem:[%s3049_s3 + $0x244] sm:$0xf] }
  0x49   : > { %v1875_v18 = vor.u32 %v2158_v28, %v1874_v25  ;;  %v2170_v47 = vld [vmem:[%s3049_s3 + $0x2c4] sm:$0xf0]  ;;  %v2164_v25 = vld [vmem:[%s3049_s3 + $0x294] sm:$0xf0]  ;;  %v2147_v28 = vld [vmem:[%s3049_s3 + $0x214] sm:$0xf] }
  0x4a   : > { %574 = vmatpush.bf16.msra.mxu0 %v2389_v1  ;;  %587 = vmatpush.bf16.msra.mxu1 %v2391_v2  ;;  %v1719_v1 = vor.u32 %v2125_v55, %v1716_v56  ;;  %v1783_v2 = vor.u32 %v2141_v59, %v1780_v60  ;;  %v2131_v56 = vld [vmem:[%s3049_s3 + $0x194] sm:$0xf]  ;;  %v2114_v60 = vld [vmem:[%s3049_s3 + $0x104] sm:$0xf0] }
  0x4b   : > { %604 = vmatpush.bf16.msra.mxu2 %v1595_v22  ;;  %617 = vmatpush.bf16.msra.mxu3 %v1599_v23  ;;  %v2135_v22 = vld [vmem:[%s3049_s3 + $0x1b4] sm:$0xf]  ;;  %v1756_v23 = vld [vmem:[%s3049_s3 + $0x1b8] sm:$0xf0] }
  0x4c   : > { %v1759_v21 = vor.u32 %v2135_v22, %v1756_v23  ;;  %v2156_v23 = vld [vmem:[%s3049_s3 + $0x254] sm:$0xf0] }
  0x4d   : > { %1628 = vmatmul.msk.bf16.vlgmr.msra.gmra.mxu0 %vm318_vm1, %v445_v43  ;;  %1629 = vmatmul.msk.bf16.vlgmr.msra.gmra.mxu1 %vm318_vm1, %v445_v43  ;;  %v1746_v43 = vld [vmem:[%s3049_s3 + $0x1a0] sm:$0xf] }
  0x4e   : > { %824 = vmatpush.bf16.msrb.mxu0 %v1723_v44  ;;  %837 = vmatpush.bf16.msrb.mxu1 %v1787_v45  ;;  %v1747_v35 = vor.u32 %v2134_v34, %v1746_v43  ;;  %v1748_v44 = vld [vmem:[%s3049_s3 + $0x1a8] sm:$0xf0]  ;;  %v1687_v45 = vor.u32 %v2117_v26, %v1684_v39  ;;  %v2155_v34 = vld [vmem:[%s3049_s3 + $0x254] sm:$0xf]  ;;  %v1931_v26 = vor.u32 %v2172_v42, %v1930_v41  ;;  %v2162_v41 = vld [vmem:[%s3049_s3 + $0x284] sm:$0xf0] }
  0x4f   : > { %1630 = vmatmul.msk.bf16.vlgmr.msra.gmra.mxu2 %vm318_vm1, %v593_v52  ;;  %1631 = vmatmul.msk.bf16.vlgmr.msra.gmra.mxu3 %vm318_vm1, %v593_v52  ;;  %v1751_v46 = vor.u32 %v2133_v40, %v1748_v44  ;;  %v2115_v52 = vld [vmem:[%s3049_s3 + $0x114] sm:$0xf]  ;;  %v1858_v40 = vld [vmem:[%s3049_s3 + $0x240] sm:$0xf]  ;;  %v2154_v44 = vld [vmem:[%s3049_s3 + $0x244] sm:$0xf0] }
  0x50   : > { %850 = vmatpush.bf16.msrb.mxu2 %v1727_v53  ;;  %863 = vmatpush.bf16.msrb.mxu3 %v1791_v54  ;;  %v1676_v53 = vld [vmem:[%s3049_s3 + $0x118] sm:$0xf0]  ;;  %v1739_v54 = vor.u32 %v2132_v51, %v1738_v49  ;;  %v1860_v49 = vld [vmem:[%s3049_s3 + $0x248] sm:$0xf0]  ;;  %v2145_v42 = vld [vmem:[%s3049_s3 + $0x204] sm:$0xf] }
  0x51   : > { %v1679_v55 = vor.u32 %v2115_v52, %v1676_v53  ;;  %v1863_v51 = vor.u32 %v2153_v48, %v1860_v49  ;;  %v2169_v52 = vld [vmem:[%s3049_s3 + $0x2c4] sm:$0xf]  ;;  %v1924_v53 = vld [vmem:[%s3049_s3 + $0x2c8] sm:$0xf0] }
  0x52   : > { %825 = vmatpush.bf16.msrb.mxu0 %v1715_v57  ;;  %838 = vmatpush.bf16.msrb.mxu1 %v1779_v58  ;;  %v1740_v57 = vld [vmem:[%s3049_s3 + $0x198] sm:$0xf0]  ;;  %v1666_v58 = vld [vmem:[%s3049_s3 + $0x100] sm:$0xf] }
  0x53   : > { %v1743_v59 = vor.u32 %v2131_v56, %v1740_v57  ;;  %v1667_v63 = vor.u32 %v2114_v60, %v1666_v58  ;;  %v2152_v56 = vld [vmem:[%s3049_s3 + $0x234] sm:$0xf0]  ;;  %v1914_v58 = vld [vmem:[%s3049_s3 + $0x2b0] sm:$0xf]  ;;  %v2151_v60 = vld [vmem:[%s3049_s3 + $0x234] sm:$0xf] }
  0x54   : > { %851 = vmatpush.bf16.msrb.mxu2 %v1719_v1  ;;  %864 = vmatpush.bf16.msrb.mxu3 %v1783_v2  ;;  %v2113_v1 = vld [vmem:[%s3049_s3 + $0x104] sm:$0xf]  ;;  %v1668_v2 = vld [vmem:[%s3049_s3 + $0x108] sm:$0xf0] }
  0x55   : > { %v1671_v4 = vor.u32 %v2113_v1, %v1668_v2  ;;  %v1855_v1 = vor.u32 %v2151_v60, %v1852_v62  ;;  %v2074_v60 = vld [vmem:[%s3049_s3 + $0xf0] sm:$0xf]  ;;  %v2191_v62 = vld [vmem:[%s3049_s3 + $0x74] sm:$0xf] }
  0x56   : > { %826 = vmatpush.bf16.msrb.mxu0 %v1707_v5  ;;  %839 = vmatpush.bf16.msrb.mxu1 %v1771_v6  ;;  %v1732_v5 = vld [vmem:[%s3049_s3 + $0x188] sm:$0xf0]  ;;  %v1882_v6 = vld [vmem:[%s3049_s3 + $0x270] sm:$0xf] }
  0x57   : > { %v1735_v8 = vor.u32 %v2129_v3, %v1732_v5  ;;  %v1883_v9 = vor.u32 %v2160_v7, %v1882_v6  ;;  %v1842_v3 = vld [vmem:[%s3049_s3 + $0x220] sm:$0xf]  ;;  %v2166_v7 = vld [vmem:[%s3049_s3 + $0x2a4] sm:$0xf0] }
  0x58   : > { %852 = vmatpush.bf16.msrb.mxu2 %v1711_v13  ;;  %865 = vmatpush.bf16.msrb.mxu3 %v1775_v14  ;;  %v1947_v13 = vor.u32 %v2176_v11, %v1946_v10  ;;  %v1884_v14 = vld [vmem:[%s3049_s3 + $0x278] sm:$0xf0]  ;;  %v1906_v5 = vld [vmem:[%s3049_s3 + $0x2a0] sm:$0xf] }
  0x59   : > { %v1907_v10 = vor.u32 %v2166_v7, %v1906_v5 }
  0x5a   : > { %827 = vmatpush.bf16.msrb.mxu0 %v1699_v17  ;;  %840 = vmatpush.bf16.msrb.mxu1 %v1763_v24  ;;  %v1887_v17 = vor.u32 %v2159_v12, %v1884_v14  ;;  %v1951_v24 = vor.u32 %v2175_v15, %v1948_v16  ;;  %v2165_v12 = vld [vmem:[%s3049_s3 + $0x2a4] sm:$0xf]  ;;  %v1834_v15 = vld [vmem:[%s3049_s3 + $0x210] sm:$0xf]  ;;  %v2148_v16 = vld [vmem:[%s3049_s3 + $0x214] sm:$0xf0] }
  0x5c   : > { %853 = vmatpush.bf16.msrb.mxu2 %v1703_v31  ;;  %866 = vmatpush.bf16.msrb.mxu3 %v1767_v32  ;;  %v1876_v31 = vld [vmem:[%s3049_s3 + $0x268] sm:$0xf0]  ;;  %v1939_v32 = vor.u32 %v2174_v19, %v1938_v29  ;;  %v1836_v29 = vld [vmem:[%s3049_s3 + $0x218] sm:$0xf0] }
  0x5d   : > { %v1879_v33 = vor.u32 %v2157_v30, %v1876_v31  ;;  %v1839_v19 = vor.u32 %v2147_v28, %v1836_v29  ;;  %v2163_v30 = vld [vmem:[%s3049_s3 + $0x294] sm:$0xf]  ;;  %v1900_v31 = vld [vmem:[%s3049_s3 + $0x298] sm:$0xf0]  ;;  %v2205_v28 = vld [vmem:[%s3049_s3 + $0xe4] sm:$0xf] }
  0x5e   : > { %828 = vmatpush.bf16.msrb.mxu0 %v1691_v37  ;;  %841 = vmatpush.bf16.msrb.mxu1 %v1755_v38  ;;  %v1940_v37 = vld [vmem:[%s3049_s3 + $0x2e8] sm:$0xf0]  ;;  %v1866_v38 = vld [vmem:[%s3049_s3 + $0x250] sm:$0xf] }
  0x5f   : > { %v1943_v22 = vor.u32 %v2173_v36, %v1940_v37  ;;  %v1867_v43 = vor.u32 %v2156_v23, %v1866_v38  ;;  %v1826_v37 = vld [vmem:[%s3049_s3 + $0x200] sm:$0xf]  ;;  %v2146_v38 = vld [vmem:[%s3049_s3 + $0x204] sm:$0xf0]  ;;  %v2068_v29 = vld [vmem:[%s3049_s3 + $0xe8] sm:$0xf0] }
  0x60   : > { %854 = vmatpush.bf16.msrb.mxu2 %v1695_v20  ;;  %867 = vmatpush.bf16.msrb.mxu3 %v1759_v21  ;;  %v1868_v20 = vld [vmem:[%s3049_s3 + $0x258] sm:$0xf0]  ;;  %v2171_v21 = vld [vmem:[%s3049_s3 + $0x2d4] sm:$0xf]  ;;  %v1827_v23 = vor.u32 %v2146_v38, %v1826_v37  ;;  %v2204_v37 = vld [vmem:[%s3049_s3 + $0xd4] sm:$0xf0] }
  0x61   : > { %v2187_v38 = vld [vmem:[%s3049_s3 + $0x54] sm:$0xf] }
  0x62   : > { %829 = vmatpush.bf16.msrb.mxu0 %v1683_v27  ;;  %842 = vmatpush.bf16.msrb.mxu1 %v1747_v35  ;;  %v1871_v27 = vor.u32 %v2155_v34, %v1868_v20  ;;  %v1932_v35 = vld [vmem:[%s3049_s3 + $0x2d8] sm:$0xf0] }
  0x63   : > { %v1935_v39 = vor.u32 %v2171_v21, %v1932_v35  ;;  %v2161_v21 = vld [vmem:[%s3049_s3 + $0x284] sm:$0xf] }
  0x64   : > { %855 = vmatpush.bf16.msrb.mxu2 %v1687_v45  ;;  %868 = vmatpush.bf16.msrb.mxu3 %v1751_v46  ;;  %v1922_v45 = vld [vmem:[%s3049_s3 + $0x2c0] sm:$0xf]  ;;  %v1859_v46 = vor.u32 %v2154_v44, %v1858_v40 }
  0x66   : > { %830 = vmatpush.bf16.msrb.mxu0 %v1675_v50  ;;  %843 = vmatpush.bf16.msrb.mxu1 %v1739_v54  ;;  %v1923_v50 = vor.u32 %v2170_v47, %v1922_v45  ;;  %v1927_v54 = vor.u32 %v2169_v52, %v1924_v53  ;;  %v2823_v45 = vld [vmem:[%s3048_s2] sm:$0x3] }
  0x68   : > { %856 = vmatpush.bf16.msrb.mxu2 %v1679_v55  ;;  %869 = vmatpush.bf16.msrb.mxu3 %v1743_v59  ;;  %v1850_v55 = vld [vmem:[%s3049_s3 + $0x230] sm:$0xf]  ;;  %v2168_v59 = vld [vmem:[%s3049_s3 + $0x2b4] sm:$0xf0] }
  0x69   : > { %v1851_v57 = vor.u32 %v2152_v56, %v1850_v55  ;;  %v1915_v61 = vor.u32 %v2168_v59, %v1914_v58  ;;  %v2010_v58 = vld [vmem:[%s3049_s3 + $0x70] sm:$0xf]  ;;  %v2192_v59 = vld [vmem:[%s3049_s3 + $0x74] sm:$0xf0] }
  0x6a   : > { %831 = vmatpush.bf16.msrb.mxu0 %v1667_v63  ;;  %844 = vmatpush.bf16.msrb.mxu1 %v1731_v0  ;;  %v2167_v63 = vld [vmem:[%s3049_s3 + $0x2b4] sm:$0xf]  ;;  %v1916_v0 = vld [vmem:[%s3049_s3 + $0x2b8] sm:$0xf0] }
  0x6b   : > { %v1919_v2 = vor.u32 %v2167_v63, %v1916_v0  ;;  %v2012_v63 = vld [vmem:[%s3049_s3 + $0x78] sm:$0xf0] }
  0x6c   : > { %857 = vmatpush.bf16.msrb.mxu2 %v1671_v4  ;;  %870 = vmatpush.bf16.msrb.mxu3 %v1735_v8  ;;  %v2150_v4 = vld [vmem:[%s3049_s3 + $0x224] sm:$0xf0]  ;;  %v2149_v8 = vld [vmem:[%s3049_s3 + $0x224] sm:$0xf] }
  0x6d   : > { %v1843_v6 = vor.u32 %v2150_v4, %v1842_v3  ;;  %v2076_v3 = vld [vmem:[%s3049_s3 + $0xf8] sm:$0xf0] }
  0x6e   : > { %1071 = vmatpush.bf16.msra.mxu0 %v1883_v9  ;;  %1084 = vmatpush.bf16.msra.mxu1 %v1947_v13  ;;  %v1844_v9 = vld [vmem:[%s3049_s3 + $0x228] sm:$0xf0] }
  0x6f   : > { %v1847_v11 = vor.u32 %v2149_v8, %v1844_v9  ;;  %v1908_v13 = vld [vmem:[%s3049_s3 + $0x2a8] sm:$0xf0]  ;;  %v2011_v8 = vor.u32 %v2192_v59, %v2010_v58  ;;  %v2042_v59 = vld [vmem:[%s3049_s3 + $0xb0] sm:$0xf] }
  0x70   : > { %1097 = vmatpush.bf16.msra.mxu2 %v1887_v17  ;;  %1110 = vmatpush.bf16.msra.mxu3 %v1951_v24  ;;  %v1911_v14 = vor.u32 %v2165_v12, %v1908_v13  ;;  %v1898_v17 = vld [vmem:[%s3049_s3 + $0x290] sm:$0xf]  ;;  %v1835_v24 = vor.u32 %v2148_v16, %v1834_v15  ;;  %v2066_v16 = vld [vmem:[%s3049_s3 + $0xe0] sm:$0xf] }
  0x72   : > { %1072 = vmatpush.bf16.msra.mxu0 %v1875_v18  ;;  %1085 = vmatpush.bf16.msra.mxu1 %v1939_v32  ;;  %v1899_v18 = vor.u32 %v2164_v25, %v1898_v17  ;;  %v1903_v32 = vor.u32 %v2163_v30, %v1900_v31  ;;  %v2206_v17 = vld [vmem:[%s3049_s3 + $0xe4] sm:$0xf0]  ;;  %v2004_v25 = vld [vmem:[%s3049_s3 + $0x68] sm:$0xf0]  ;;  %v1994_v30 = vld [vmem:[%s3049_s3 + $0x50] sm:$0xf] }
  0x73   : > { %v2188_v31 = vld [vmem:[%s3049_s3 + $0x54] sm:$0xf0] }
  0x74   : > { %1098 = vmatpush.bf16.msra.mxu2 %v1879_v33  ;;  %1111 = vmatpush.bf16.msra.mxu3 %v1943_v22  ;;  %v1890_v22 = vld [vmem:[%s3049_s3 + $0x280] sm:$0xf] }
  0x75   : > { %v1891_v34 = vor.u32 %v2162_v41, %v1890_v22  ;;  %v1996_v22 = vld [vmem:[%s3049_s3 + $0x58] sm:$0xf0] }
  0x76   : > { %1073 = vmatpush.bf16.msra.mxu0 %v1867_v43  ;;  %1086 = vmatpush.bf16.msra.mxu1 %v1931_v26  ;;  %v1828_v43 = vld [vmem:[%s3049_s3 + $0x208] sm:$0xf0]  ;;  %v2060_v41 = vld [vmem:[%s3049_s3 + $0xd8] sm:$0xf0] }
  0x77   : > { %v1831_v20 = vor.u32 %v2145_v42, %v1828_v43  ;;  %v1892_v26 = vld [vmem:[%s3049_s3 + $0x288] sm:$0xf0] }
  0x78   : > { %1099 = vmatpush.bf16.msra.mxu2 %v1871_v27  ;;  %1112 = vmatpush.bf16.msra.mxu3 %v1935_v39  ;;  %v1895_v27 = vor.u32 %v2161_v21, %v1892_v26  ;;  %v1986_v21 = vld [vmem:[%s3049_s3 + $0x40] sm:$0xf]  ;;  %v2186_v26 = vld [vmem:[%s3049_s3 + $0x44] sm:$0xf0] }
  0x7a   : > { %1074 = vmatpush.bf16.msra.mxu0 %v1859_v46  ;;  %1087 = vmatpush.bf16.msra.mxu1 %v1923_v50  ;;  %v529_v50 = vperm.slane %v2823_v45, 0 }
  0x7c   : > { %1100 = vmatpush.bf16.msra.mxu2 %v1863_v51  ;;  %1113 = vmatpush.bf16.msra.mxu3 %v1927_v54  ;;  %v530_v51 = vperm.slane %v2823_v45, 1 }
  0x7e   : > { %1075 = vmatpush.bf16.msra.mxu0 %v1851_v57  ;;  %1088 = vmatpush.bf16.msra.mxu1 %v1915_v61  ;;  %v2208_v61 = vld [vmem:[%s3049_s3 + $0xf4] sm:$0xf0] }
  0x7f   : > { %v2075_v9 = vor.u32 %v2208_v61, %v2074_v60  ;;  %v2200_v60 = vld [vmem:[%s3049_s3 + $0xb4] sm:$0xf0]  ;;  %v2183_v61 = vld [vmem:[%s3049_s3 + $0x34] sm:$0xf] }
  0x80   : > { %1101 = vmatpush.bf16.msra.mxu2 %v1855_v1  ;;  %1114 = vmatpush.bf16.msra.mxu3 %v1919_v2  ;;  %v2207_v2 = vld [vmem:[%s3049_s3 + $0xf4] sm:$0xf] }
  0x81   : > { %v2079_v15 = vor.u32 %v2207_v2, %v2076_v3 }
  0x82   : > { %1076 = vmatpush.bf16.msra.mxu0 %v1843_v6  ;;  %1089 = vmatpush.bf16.msra.mxu1 %v1907_v10  ;;  %v2002_v10 = vld [vmem:[%s3049_s3 + $0x60] sm:$0xf] }
  0x84   : > { %1102 = vmatpush.bf16.msra.mxu2 %v1847_v11  ;;  %1115 = vmatpush.bf16.msra.mxu3 %v1911_v14  ;;  %v2190_v11 = vld [vmem:[%s3049_s3 + $0x64] sm:$0xf0]  ;;  %v2015_v14 = vor.u32 %v2191_v62, %v2012_v63  ;;  %v1980_v62 = vld [vmem:[%s3049_s3 + $0x38] sm:$0xf0]  ;;  %v2199_v63 = vld [vmem:[%s3049_s3 + $0xb4] sm:$0xf] }
  0x86   : > { %1077 = vmatpush.bf16.msra.mxu0 %v1835_v24  ;;  %1090 = vmatpush.bf16.msra.mxu1 %v1899_v18  ;;  %v2189_v24 = vld [vmem:[%s3049_s3 + $0x64] sm:$0xf]  ;;  %v2003_v18 = vor.u32 %v2190_v11, %v2002_v10  ;;  %v1983_v11 = vor.u32 %v2183_v61, %v1980_v62 }
  0x88   : > { %1103 = vmatpush.bf16.msra.mxu2 %v1839_v19  ;;  %1116 = vmatpush.bf16.msra.mxu3 %v1903_v32  ;;  %v2067_v19 = vor.u32 %v2206_v17, %v2066_v16  ;;  %v2007_v32 = vor.u32 %v2189_v24, %v2004_v25  ;;  %v1972_v24 = vld [vmem:[%s3049_s3 + $0x28] sm:$0xf0]  ;;  %v2197_v25 = vld [vmem:[%s3049_s3 + $0xa4] sm:$0xf] }
  0x8a   : > { %1078 = vmatpush.bf16.msra.mxu0 %v1827_v23  ;;  %1091 = vmatpush.bf16.msra.mxu1 %v1891_v34  ;;  %v2203_v23 = vld [vmem:[%s3049_s3 + $0xd4] sm:$0xf]  ;;  %v1995_v34 = vor.u32 %v2188_v31, %v1994_v30  ;;  %v1962_v31 = vld [vmem:[%s3049_s3 + $0x10] sm:$0xf] }
  0x8c   : > { %1104 = vmatpush.bf16.msra.mxu2 %v1831_v20  ;;  %1117 = vmatpush.bf16.msra.mxu3 %v1895_v27  ;;  %v1999_v27 = vor.u32 %v2187_v38, %v1996_v22 }
  0xa2   : > { %v338_v33 = vpop.f32.mrf.mxu0  ;;  %v351_v36 = vpop.f32.mrf.mxu1 }
  0xaa   : > { %v340_v40 = vpop.f32.mrf.mxu0  ;;  %v353_v44 = vpop.f32.mrf.mxu1 }
  0xab   : > { %v418_v35 = vpop.f32.mrf.mxu2  ;;  %v431_v39 = vpop.f32.mrf.mxu3  ;;  %v2202_v40 = vld [vmem:[%s3049_s3 + $0xc4] sm:$0xf0]  ;;  %v2185_v44 = vld [vmem:[%s3049_s3 + $0x44] sm:$0xf] }
  0xac   : > { %v419_v48 = vadd.f32 %v418_v35, %v338_v33  ;;  %v432_v49 = vadd.f32 %v431_v39, %v351_v36  ;;  %v2071_v33 = vor.u32 %v2205_v28, %v2068_v29  ;;  %v2058_v36 = vld [vmem:[%s3049_s3 + $0xd0] sm:$0xf]  ;;  %v2063_v35 = vor.u32 %v2203_v23, %v2060_v41  ;;  %v2050_v39 = vld [vmem:[%s3049_s3 + $0xc0] sm:$0xf]  ;;  %v2036_v28 = vld [vmem:[%s3049_s3 + $0xa8] sm:$0xf0] }
  0xad   : > { %v2059_v20 = vor.u32 %v2204_v37, %v2058_v36  ;;  %v2039_v45 = vor.u32 %v2197_v25, %v2036_v28  ;;  %v2179_v36 = vld [vmem:[%s3049_s3 + $0x14] sm:$0xf]  ;;  %v1964_v37 = vld [vmem:[%s3049_s3 + $0x18] sm:$0xf0]  ;;  %v2276_v28 = vmov 0.0  }
  0xae   : > { %v2195_v23 = vld [vmem:[%s3049_s3 + $0x94] sm:$0xf]  ;;  %v2028_v41 = vld [vmem:[%s3049_s3 + $0x98] sm:$0xf0] }
  0xb3   : > { %v420_v46 = vpop.f32.mrf.mxu2  ;;  %v433_v47 = vpop.f32.mrf.mxu3 }
  0xb6   : > { %v509_v52 = vpop.f32.mrf.mxu0  ;;  %v522_v53 = vpop.f32.mrf.mxu1 }
  0xb7   : > { %v526_v54 = vadd.f32 %v509_v52, %v419_v48  ;;  %v527_v55 = vadd.f32 %v522_v53, %v432_v49  ;;  %v1988_v48 = vld [vmem:[%s3049_s3 + $0x48] sm:$0xf0]  ;;  %v2201_v49 = vld [vmem:[%s3049_s3 + $0xc4] sm:$0xf]  ;;  %v1987_v53 = vor.u32 %v2186_v26, %v1986_v21  ;;  %v1954_v21 = vld [vmem:[%s3049_s3] sm:$0xf] }
  0xb8   : > { %v2052_v52 = vld [vmem:[%s3049_s3 + $0xc8] sm:$0xf0]  ;;  %v2178_v26 = vld [vmem:[%s3049_s3 + $0x4] sm:$0xf0] }
  0xb9   : > { %v533_v56 = vadd.f32 %v529_v50, %v526_v54  ;;  %v534_v57 = vadd.f32 %v530_v51, %v527_v55  ;;  %v2051_v54 = vor.u32 %v2202_v40, %v2050_v39  ;;  %v1978_v55 = vld [vmem:[%s3049_s3 + $0x30] sm:$0xf]  ;;  %v2055_v58 = vor.u32 %v2201_v49, %v2052_v52  ;;  %v2193_v49 = vld [vmem:[%s3049_s3 + $0x84] sm:$0xf]  ;;  %v2020_v52 = vld [vmem:[%s3049_s3 + $0x88] sm:$0xf0] }
  0xba   : > { %v1967_v39 = vor.u32 %v2179_v36, %v1964_v37  ;;  %v2031_v40 = vor.u32 %v2195_v23, %v2028_v41  ;;  %v1427_v37 = vld [vmem:[%s3050_s4] sm:$0x3] }
  0xbb   : > { %v535_v0 = vmax.f32 %v533_v56, 0.0  ;;  %v536_v1 = vmax.f32 %v534_v57, 0.0  ;;  %v2184_v56 = vld [vmem:[%s3049_s3 + $0x34] sm:$0xf0]  ;;  %v1991_v57 = vor.u32 %v2185_v44, %v1988_v48  ;;  %v2018_v44 = vld [vmem:[%s3049_s3 + $0x80] sm:$0xf] }
  0xbc   : > { %v1956_v48 = vld [vmem:[%s3049_s3 + $0x8] sm:$0xf0]  ;;  %v1430_v41 = vperm.slane %v1427_v37, 1 }
  0xbd   : > { %v662_v4 = vpack.c.bf16 %v535_v0, %v535_v0  ;;  %v663_v5 = vpack.c.bf16 %v536_v1, %v536_v1  ;;  %v2044_v0 = vld [vmem:[%s3049_s3 + $0xb8] sm:$0xf0]  ;;  %v1979_v1 = vor.u32 %v2184_v56, %v1978_v55  ;;  %v2023_v56 = vor.u32 %v2193_v49, %v2020_v52 }
  0xbe   : > { %v511_v12 = vpop.f32.mrf.mxu0  ;;  %v524_v13 = vpop.f32.mrf.mxu1 }
  0xbf   : > { %v2855_v6 = vpop.f32.mrf.mxu2  ;;  %v2857_v7 = vpop.f32.mrf.mxu3  ;;  %832 = vmatmul.bf16.vlgmr.msrb.gmra.mxu0 %v662_v4  ;;  %845 = vmatmul.bf16.vlgmr.msrb.gmra.mxu1 %v663_v5  ;;  %v2047_v12 = vor.u32 %v2199_v63, %v2044_v0  ;;  %v2181_v13 = vld [vmem:[%s3049_s3 + $0x24] sm:$0xf] }
  0xc0   : > { %858 = vmatmul.bf16.vlgmr.msrb.gmra.mxu2 %v662_v4  ;;  %871 = vmatmul.bf16.vlgmr.msrb.gmra.mxu3 %v663_v5  ;;  %v2043_v4 = vor.u32 %v2200_v60, %v2042_v59  ;;  %v1970_v5 = vld [vmem:[%s3049_s3 + $0x20] sm:$0xf] }
  0xc1   : > { %1315 = vmatpush.bf16.msrb.mxu0 %v2011_v8  ;;  %1328 = vmatpush.bf16.msrb.mxu1 %v2075_v9  ;;  %v2182_v8 = vld [vmem:[%s3049_s3 + $0x24] sm:$0xf0] }
  0xc2   : > { %1341 = vmatpush.bf16.msrb.mxu2 %v2015_v14  ;;  %1354 = vmatpush.bf16.msrb.mxu3 %v2079_v15  ;;  %v1971_v29 = vor.u32 %v2182_v8, %v1970_v5  ;;  %v1367_v8 = vlaneseq }
  0xc5   : > { %1316 = vmatpush.bf16.msrb.mxu0 %v2003_v18  ;;  %1329 = vmatpush.bf16.msrb.mxu1 %v2067_v19 }
  0xc6   : > { %1342 = vmatpush.bf16.msrb.mxu2 %v2007_v32  ;;  %1355 = vmatpush.bf16.msrb.mxu3 %v2071_v33  ;;  %v2180_v32 = vld [vmem:[%s3049_s3 + $0x14] sm:$0xf0]  ;;  %v2026_v33 = vld [vmem:[%s3049_s3 + $0x90] sm:$0xf] }
  0xc7   : > { %v552_v42 = vpop.f32.mrf.mxu2  ;;  %v565_v43 = vpop.f32.mrf.mxu3 }
  0xc8   : > { %v1963_v42 = vor.u32 %v2180_v32, %v1962_v31 }
  0xc9   : > { %1317 = vmatpush.bf16.msrb.mxu0 %v1995_v34  ;;  %1330 = vmatpush.bf16.msrb.mxu1 %v2059_v20 }
  0xca   : > { %v576_v46 = vpop.f32.mrf.mxu0  ;;  %v589_v47 = vpop.f32.mrf.mxu1  ;;  %1343 = vmatpush.bf16.msrb.mxu2 %v1999_v27  ;;  %1356 = vmatpush.bf16.msrb.mxu3 %v2063_v35 }
  0xcb   : > { %v577_v2 = vadd.f32 %v576_v46, %v2855_v6  ;;  %v590_v3 = vadd.f32 %v589_v47, %v2857_v7  ;;  %v2034_v6 = vld [vmem:[%s3049_s3 + $0xa0] sm:$0xf]  ;;  %v2198_v7 = vld [vmem:[%s3049_s3 + $0xa4] sm:$0xf0]  ;;  %v2177_v47 = vld [vmem:[%s3049_s3 + $0x4] sm:$0xf] }
  0xcc   : > { %v2035_v30 = vor.u32 %v2198_v7, %v2034_v6  ;;  %v2194_v46 = vld [vmem:[%s3049_s3 + $0x84] sm:$0xf0]  ;;  %v1959_v55 = vor.u32 %v2177_v47, %v1956_v48 }
  0xcd   : > { %1318 = vmatpush.bf16.msrb.mxu0 %v1987_v53  ;;  %1331 = vmatpush.bf16.msrb.mxu1 %v2051_v54  ;;  %v1955_v53 = vor.u32 %v2178_v26, %v1954_v21  ;;  %v2019_v54 = vor.u32 %v2194_v46, %v2018_v44 }
  0xce   : > { %1344 = vmatpush.bf16.msrb.mxu2 %v1991_v57  ;;  %1357 = vmatpush.bf16.msrb.mxu3 %v2055_v58 }
  0xd1   : > { %1319 = vmatpush.bf16.msrb.mxu0 %v1979_v1  ;;  %1332 = vmatpush.bf16.msrb.mxu1 %v2043_v4 }
  0xd2   : > { %v606_v9 = vpop.f32.mrf.mxu2  ;;  %v619_v10 = vpop.f32.mrf.mxu3  ;;  %1345 = vmatpush.bf16.msrb.mxu2 %v1983_v11  ;;  %1358 = vmatpush.bf16.msrb.mxu3 %v2047_v12 }
  0xd3   : > { %v623_v14 = vadd.f32 %v606_v9, %v577_v2  ;;  %v624_v15 = vadd.f32 %v619_v10, %v590_v3  ;;  %v578_v16 = vpop.f32.mrf.mxu0  ;;  %v591_v17 = vpop.f32.mrf.mxu1  ;;  %v1370_v9 = vand.u32 127, %v1367_v8 }
  0xd5   : > { %v625_v18 = vadd.f32 %v623_v14, %v529_v50  ;;  %v626_v19 = vadd.f32 %v624_v15, %v530_v51  ;;  %v1975_v50 = vor.u32 %v2181_v13, %v1972_v24  ;;  %v2196_v51 = vld [vmem:[%s3049_s3 + $0x94] sm:$0xf0]  ;;  %1320 = vmatpush.bf16.msrb.mxu0 %v1971_v29  ;;  %1333 = vmatpush.bf16.msrb.mxu1 %v2035_v30  ;;  %v1368_v13 = vshrl.u32 %v1367_v8, 7 }
  0xd6   : > { %v2027_v20 = vor.u32 %v2196_v51, %v2026_v33  ;;  %1359 = vmatpush.bf16.msrb.mxu3 %v2039_v45  ;;  %v1371_v14 = vadd.s32 1, %v1370_v9 }
  0xd7   : > { %v627_v38 = vmax.f32 %v625_v18, 0.0  ;;  %v628_v22 = vmax.f32 %v626_v19, 0.0  ;;  %1346 = vmatpush.bf16.msrb.mxu2 %v1975_v50 }
  0xd8   : > { %vm1372_vm2 = vcmp.eq.s32.totalorder %v1368_v13, %v1371_v14 }
  0xd9   : > { %v909_v43 = vpack.c.bf16 %v627_v38, %v627_v38  ;;  %v910_v34 = vpack.c.bf16 %v628_v22, %v628_v22  ;;  %1321 = vmatpush.bf16.msrb.mxu0 %v1963_v42  ;;  %1334 = vmatpush.bf16.msrb.mxu1 %v2027_v20  ;;  %v2080_v29 = vsel %vm1372_vm2, 1.0, %v2276_v28  ;;  %v1429_v22 = vperm.slane %v1427_v37, 0 }
  0xda   : > { %v608_v27 = vpop.f32.mrf.mxu2  ;;  %v621_v35 = vpop.f32.mrf.mxu3  ;;  %1360 = vmatpush.bf16.msrb.mxu3 %v2031_v40 }
  0xdb   : > { %1079 = vmatmul.bf16.vlgmr.msra.gmra.mxu0 %v909_v43  ;;  %1092 = vmatmul.bf16.vlgmr.msra.gmra.mxu1 %v910_v34 }
  0xdc   : > { %1105 = vmatmul.bf16.vlgmr.msra.gmra.mxu2 %v909_v43  ;;  %1118 = vmatmul.bf16.vlgmr.msra.gmra.mxu3 %v910_v34 }
  0xdd   : > { %1347 = vmatpush.bf16.msrb.mxu2 %v1967_v39  ;;  %1322 = vmatpush.bf16.msrb.mxu0 %v1955_v53 }
  0xde   : > { %1335 = vmatpush.bf16.msrb.mxu1 %v2019_v54  ;;  %1361 = vmatpush.bf16.msrb.mxu3 %v2023_v56 }
  0xe1   : > { %1348 = vmatpush.bf16.msrb.mxu2 %v1959_v55 }
  0xeb   : > { %1323 = vmatmul.bf16.vlgmr.msrb.gmra.mxu0 %v909_v43  ;;  %1336 = vmatmul.bf16.vlgmr.msrb.gmra.mxu1 %v910_v34 }
  0xec   : > { %1349 = vmatmul.bf16.vlgmr.msrb.gmra.mxu2 %v909_v43  ;;  %1362 = vmatmul.bf16.vlgmr.msrb.gmra.mxu3 %v910_v34 }
 0x13c   : > { %v833_v57 = vpop.f32.mrf.mxu0  ;;  %v846_v58 = vpop.f32.mrf.mxu1 }
 0x13d   : > { %v847_v59 = vadd.f32 %v846_v58, %v833_v57 }
 0x143   : > { %v859_v60 = vpop.f32.mrf.mxu2  ;;  %v872_v61 = vpop.f32.mrf.mxu3 }
 0x144   : > { %v873_v62 = vadd.f32 %v872_v61, %v859_v60  ;;  %v835_v63 = vpop.f32.mrf.mxu0  ;;  %v848_v0 = vpop.f32.mrf.mxu1 }
 0x14b   : > { %v861_v1 = vpop.f32.mrf.mxu2  ;;  %v874_v2 = vpop.f32.mrf.mxu3 }
 0x158   : > { %v1080_v3 = vpop.f32.mrf.mxu0  ;;  %v1093_v4 = vpop.f32.mrf.mxu1 }
 0x159   : > { %v1094_v5 = vadd.f32 %v1093_v4, %v1080_v3 }
 0x15f   : > { %v1106_v10 = vpop.f32.mrf.mxu2  ;;  %v1119_v11 = vpop.f32.mrf.mxu3 }
 0x160   : > { %v1120_v12 = vadd.f32 %v1119_v11, %v1106_v10  ;;  %v1082_v6 = vpop.f32.mrf.mxu0  ;;  %v1095_v7 = vpop.f32.mrf.mxu1 }
 0x167   : > { %v1108_v15 = vpop.f32.mrf.mxu2  ;;  %v1121_v16 = vpop.f32.mrf.mxu3 }
 0x168   : > { %v1324_v17 = vpop.f32.mrf.mxu0  ;;  %v1337_v24 = vpop.f32.mrf.mxu1 }
 0x169   : > { %v1338_v25 = vadd.f32 %v1337_v24, %v1324_v17 }
 0x16b   : > { %2081 = vmatpush.msk.msra.mxu0 %vm322_vm0, %v1338_v25 }
 0x16c   : > { %2082 = vmatmul.msk.f32.vlgmr.msra.gmra.mxu0 %vm1375_vm3, %v2080_v29 }
 0x16f   : > { %v1350_v18 = vpop.f32.mrf.mxu2  ;;  %v1363_v19 = vpop.f32.mrf.mxu3 }
 0x170   : > { %v1364_v30 = vadd.f32 %v1363_v19, %v1350_v18  ;;  %v1326_v31 = vpop.f32.mrf.mxu0  ;;  %v1339_v32 = vpop.f32.mrf.mxu1 }
 0x172   : > { %2083 = vmatpush.msk.msra.mxu1 %vm322_vm0, %v1364_v30 }
 0x173   : > { %2084 = vmatmul.msk.f32.vlgmr.msra.gmra.mxu1 %vm1375_vm3, %v2080_v29 }
 0x177   : > { %v1352_v33 = vpop.f32.mrf.mxu2  ;;  %v1365_v50 = vpop.f32.mrf.mxu3 }
 0x1e9   : > { %v1402_v45 = vpop.f32.mrf.mxu0 }
 0x1ea   : > { %v1403_v51 = vadd.f32 %v1402_v45, %v847_v59 }
 0x1ec   : > { %v1425_v36 = vadd.f32 %v1403_v51, %v1094_v5 }
 0x1ee   : > { %v1433_v43 = vadd.f32 %v1429_v22, %v1425_v36 }
 0x1f0   : > { %v1422_v38 = vpop.f32.mrf.mxu1  ;;  %v1435_v21 = vmax.f32 %v1433_v43, 0.0 }
 0x1f1   : > { %v1423_v23 = vadd.f32 %v1422_v38, %v873_v62 }
 0x1f3   : > { %v1426_v42 = vadd.f32 %v1423_v23, %v1120_v12 }
 0x1f5   : > { %v1434_v34 = vadd.f32 %v1430_v41, %v1426_v42 }
 0x1f7   : > { %v1436_v20 = vmax.f32 %v1434_v34, 0.0 }
 0x1f9   : > { %v1439_v26 = vrot.slane %v1436_v20, 4 }
 0x1fb   : > { %v1440_v27 = vsel %vm322_vm0, %v1435_v21, %v1439_v26 }
 0x1fc   : > { %1442 = vst [vmem:[%s241_s6] sm:$0xff] %v1440_v27 }
 0x1fd PF: > { %s16_s18 = sadd.s32 1, %s2271_s18  }
 0x1fe   : > { %p13_p7 = scmp.ge.s32.totalorder %s16_s18, 4  }
 0x200   :  { %15 = sbr.rel (!%p13_p7) target bundleno = 1 (0x1), region = 82 }
 0x205   :  { %1464 = vsyncpa [#allocation3], 1 }
 0x206   :  { %1466 = vsyncpa [#allocation3 + $0x1], 1 }

</bundles_post_ra>
